<compile_context>
chip_gen: v5e
topology: v5e:2x2
jax: 0.10.0
libtpu: 0.0.40
codegen_flags: <defaults>
</compile_context>

<pallas_src>
import jax
import jax.numpy as jnp
from jax.experimental import pallas as pl
from jax.experimental.pallas import tpu as pltpu

HIDDEN = 256


def _round_up(x, m):
    return (x + m - 1) // m * m


def _actor_kernel(x_ref, w1_ref, b1_ref, w2_ref, b2_ref, wh_ref, bh_ref, out_ref):
    # Cast the raw f32 state tile in-kernel (no wrapper-side padded bf16 copy).
    x = x_ref[...].astype(w1_ref.dtype)                               # (TB, S)

    # l1 + ReLU (bias-add / ReLU in f32 -> safe on v5e, exact accumulate)
    h1 = jnp.dot(x, w1_ref[...], preferred_element_type=jnp.float32)
    h1 = jnp.maximum(h1 + b1_ref[...], 0.0)                           # (TB, 256) f32

    # l2 + ReLU
    h2 = jnp.dot(h1.astype(w2_ref.dtype), w2_ref[...],
                 preferred_element_type=jnp.float32)
    h2 = jnp.maximum(h2 + b2_ref[...], 0.0)                           # (TB, 256) f32

    # fused heads l3|l4 -> one lane-dense output slab (TB, H_pad)
    out = jnp.dot(h2.astype(wh_ref.dtype), wh_ref[...],
                  preferred_element_type=jnp.float32)
    out_ref[...] = (out + bh_ref[...]).astype(out_ref.dtype)


def prepare_actor_params(params, matmul_dtype=jnp.bfloat16):
    """One-time prep (NOT per forward call): fuse l3|l4, pad the head width to
    a lane multiple, cast weights to the matmul dtype and biases to f32."""
    A = params["w3"].shape[1]
    H2 = 2 * A
    H_pad = _round_up(max(H2, 128), 128)      # lane-dense output slab width

    wh_full = jnp.concatenate([params["w3"], params["w4"]], axis=1)
    wh = (jnp.zeros((HIDDEN, H_pad), matmul_dtype)
          .at[:, :H2].set(wh_full.astype(matmul_dtype)))
    bh = (jnp.zeros((1, H_pad), jnp.float32)
          .at[:, :H2].set(jnp.concatenate([params["b3"], params["b4"]],
                                          axis=1).astype(jnp.float32)))

    return dict(
        w1=params["w1"].astype(matmul_dtype),
        b1=params["b1"].astype(jnp.float32),
        w2=params["w2"].astype(matmul_dtype),
        b2=params["b2"].astype(jnp.float32),
        wh=wh,
        bh=bh,
        action_dim=A,
        h_pad=H_pad,
        matmul_dtype=jnp.dtype(matmul_dtype),
    )


def actor_forward(state, prep):
    """state: (B, state_dim) f32.  prep: output of prepare_actor_params.

    Returns (mu, log_std), each (B, action_dim) f32.
    """
    B, S = state.shape
    A = prep["action_dim"]
    H2 = 2 * A
    H_pad = prep["h_pad"]
    mm_dtype = prep["matmul_dtype"]
    out_dtype = mm_dtype          # bf16 slab halves writeback; f32 on exact path

    # --- batch tiling --------------------------------------------------------
    B_r8 = _round_up(B, 8)
    TB = min(1024, B_r8)          # large tiles amortize ~0.35 us per grid step
    if B_r8 >= 16:                # keep >= 2 tiles so v7x megacore gets work
        TB = min(TB, _round_up((B_r8 + 1) // 2, 8))
    B_pad = _round_up(B, TB)

    # Only the batch axis is padded (zeros, f32); no feature padding, no cast.
    x = state if B_pad == B else jnp.pad(state, ((0, B_pad - B), (0, 0)))

    grid = (B_pad // TB,)
    const = lambda i: (0, 0)

    # VMEM budget from the actual resident set (double-buffered x/out, resident
    # weights, f32 intermediates + bf16 recasts), capped well below 64 MiB.
    itm = mm_dtype.itemsize
    vmem_bytes = (
        2 * TB * S * 4                                                  # x (2 bufs, f32)
        + 2 * TB * H_pad * jnp.dtype(out_dtype).itemsize                # out (2 bufs)
        + 2 * (S * HIDDEN + HIDDEN * HIDDEN + HIDDEN * H_pad) * itm     # weights
        + 2 * (2 * HIDDEN + H_pad) * 4                                  # biases
        + 6 * TB * HIDDEN * 4                                           # h1/h2 + casts
    )
    vmem_limit = min(max(int(vmem_bytes * 1.5), 4 << 20), 32 << 20)

    out = pl.pallas_call(
        _actor_kernel,
        out_shape=jax.ShapeDtypeStruct((B_pad, H_pad), out_dtype),
        grid=grid,
        in_specs=[
            # last dim == full feature dim S -> satisfies the (8,128) rule
            pl.BlockSpec((TB, S), lambda i: (i, 0)),
            pl.BlockSpec((S, HIDDEN), const),
            pl.BlockSpec((1, HIDDEN), const),
            pl.BlockSpec((HIDDEN, HIDDEN), const),
            pl.BlockSpec((1, HIDDEN), const),
            pl.BlockSpec((HIDDEN, H_pad), const),
            pl.BlockSpec((1, H_pad), const),
        ],
        out_specs=pl.BlockSpec((TB, H_pad), lambda i: (i, 0)),
        compiler_params=pltpu.CompilerParams(
            dimension_semantics=("parallel",),
            vmem_limit_bytes=vmem_limit,
        ),
    )(x, prep["w1"], prep["b1"], prep["w2"], prep["b2"], prep["wh"], prep["bh"])

    mu = out[:B, :A].astype(jnp.float32)
    log_std = out[:B, A:H2].astype(jnp.float32)
    return mu, log_std


def init_actor_params(key, state_dim, action_dim):
    """Deterministic init mimicking PyTorch nn.Linear default (U(-1/sqrt(fan_in), +))."""
    def linear(k, fan_in, fan_out):
        kw, kb = jax.random.split(k)
        bound = 1.0 / jnp.sqrt(jnp.float32(fan_in))
        w = jax.random.uniform(kw, (fan_in, fan_out), jnp.float32, -bound, bound)
        b = jax.random.uniform(kb, (1, fan_out), jnp.float32, -bound, bound)
        return w, b

    k1, k2, k3, k4 = jax.random.split(key, 4)
    w1, b1 = linear(k1, state_dim, HIDDEN)
    w2, b2 = linear(k2, HIDDEN, HIDDEN)
    w3, b3 = linear(k3, HIDDEN, action_dim)
    w4, b4 = linear(k4, HIDDEN, action_dim)
    return dict(w1=w1, b1=b1, w2=w2, b2=b2, w3=w3, b3=b3, w4=w4, b4=b4)


def actor_forward_ref(state, p):
    """Plain-JAX f32 reference for correctness checking."""
    a = jnp.maximum(state @ p["w1"] + p["b1"], 0.0)
    a = jnp.maximum(a @ p["w2"] + p["b2"], 0.0)
    return a @ p["w3"] + p["b3"], a @ p["w4"] + p["b4"]


if __name__ == "__main__":
    key = jax.random.PRNGKey(0)
    k_params, k_state = jax.random.split(key)

    batch, state_dim, action_dim = 2, 8, 4
    params = init_actor_params(k_params, state_dim, action_dim)
    state = jax.random.normal(k_state, (batch, state_dim), jnp.float32)

    mu_ref, log_std_ref = actor_forward_ref(state, params)

    # Exact-precision path (f32 matmuls, f32 output slab) — tight tolerance.
    prep32 = prepare_actor_params(params, matmul_dtype=jnp.float32)
    mu32, ls32 = actor_forward(state, prep32)
    jax.block_until_ready((mu32, ls32))
    assert mu32.shape == (batch, action_dim) and ls32.shape == (batch, action_dim)
    assert jnp.allclose(mu32, mu_ref, atol=1e-5, rtol=1e-5)
    assert jnp.allclose(ls32, log_std_ref, atol=1e-5, rtol=1e-5)

    # Default fast path (bf16 matmul operands + bf16 output slab, f32 accumulate).
    prep = prepare_actor_params(params)          # one-time weight prep
    mu, log_std = actor_forward(state, prep)
    jax.block_until_ready((mu, log_std))
    assert mu.shape == (batch, action_dim) and log_std.shape == (batch, action_dim)
    assert jnp.allclose(mu, mu_ref, atol=3e-2, rtol=3e-2)
    assert jnp.allclose(log_std, log_std_ref, atol=3e-2, rtol=3e-2)

    # Larger / non-divisible batch to exercise batch padding and a >=2-tile grid.
    big_state = jax.random.normal(jax.random.PRNGKey(1), (100, state_dim), jnp.float32)
    mu_b, ls_b = actor_forward(big_state, prep)
    jax.block_until_ready((mu_b, ls_b))
    mu_b_ref, ls_b_ref = actor_forward_ref(big_state, params)
    assert jnp.allclose(mu_b, mu_b_ref, atol=3e-2, rtol=3e-2)
    assert jnp.allclose(ls_b, ls_b_ref, atol=3e-2, rtol=3e-2)

    print("KERNEL_OK")
</pallas_src>

<mosaic_0001>
module attributes {stable_mosaic.version = 11 : i64} {
  func.func @_actor_kernel(%arg0: i32, %arg1: memref<8x8xf32, #tpu.memory_space<vmem>>, %arg2: memref<8x256xf32, #tpu.memory_space<vmem>>, %arg3: memref<1x256xf32, #tpu.memory_space<vmem>>, %arg4: memref<256x256xf32, #tpu.memory_space<vmem>>, %arg5: memref<1x256xf32, #tpu.memory_space<vmem>>, %arg6: memref<256x128xf32, #tpu.memory_space<vmem>>, %arg7: memref<1x128xf32, #tpu.memory_space<vmem>>, %arg8: memref<8x128xf32, #tpu.memory_space<vmem>>) attributes {dimension_semantics = [#tpu.dimension_semantics<parallel>], iteration_bounds = array<i64: 1>, scalar_prefetch = 0 : i64, scratch_operands = 0 : i64, tpu.core_type = #tpu.core_type<tc>, window_params = [{transform_indices = @transform_0, window_bounds = array<i64: 8, 8>}, {pipeline_mode = #tpu.pipeline_mode<synchronous>, transform_indices = @transform_1, window_bounds = array<i64: 8, 256>}, {pipeline_mode = #tpu.pipeline_mode<synchronous>, transform_indices = @transform_2, window_bounds = array<i64: 1, 256>}, {pipeline_mode = #tpu.pipeline_mode<synchronous>, transform_indices = @transform_3, window_bounds = array<i64: 256, 256>}, {pipeline_mode = #tpu.pipeline_mode<synchronous>, transform_indices = @transform_4, window_bounds = array<i64: 1, 256>}, {pipeline_mode = #tpu.pipeline_mode<synchronous>, transform_indices = @transform_5, window_bounds = array<i64: 256, 128>}, {pipeline_mode = #tpu.pipeline_mode<synchronous>, transform_indices = @transform_6, window_bounds = array<i64: 1, 128>}, {transform_indices = @transform_7, window_bounds = array<i64: 8, 128>}]} {
    %c0 = arith.constant 0 : index
    %c0_0 = arith.constant 0 : index
    %0 = vector.load %arg1[%c0, %c0_0] : memref<8x8xf32, #tpu.memory_space<vmem>>, vector<8x8xf32>
    %c0_1 = arith.constant 0 : index
    %c0_2 = arith.constant 0 : index
    %1 = vector.load %arg2[%c0_1, %c0_2] : memref<8x256xf32, #tpu.memory_space<vmem>>, vector<8x256xf32>
    %cst = arith.constant dense<0.000000e+00> : vector<8x256xf32>
    %2 = tpu.matmul %0, %1, %cst {dimension_numbers = #tpu.dot_dimension_numbers<[1], [0], [0], [1], [0, 0, 1, 1], [], []>} : vector<8x8xf32>, vector<8x256xf32>, vector<8x256xf32> -> vector<8x256xf32>
    %c0_3 = arith.constant 0 : index
    %c0_4 = arith.constant 0 : index
    %3 = vector.load %arg3[%c0_3, %c0_4] : memref<1x256xf32, #tpu.memory_space<vmem>>, vector<1x256xf32>
    %4 = vector.broadcast %3 : vector<1x256xf32> to vector<8x256xf32>
    %5 = arith.addf %2, %4 : vector<8x256xf32>
    %cst_5 = arith.constant 0.000000e+00 : f32
    %6 = vector.broadcast %cst_5 : f32 to vector<8x256xf32>
    %7 = arith.maximumf %5, %6 : vector<8x256xf32>
    %c0_6 = arith.constant 0 : index
    %c0_7 = arith.constant 0 : index
    %8 = vector.load %arg4[%c0_6, %c0_7] : memref<256x256xf32, #tpu.memory_space<vmem>>, vector<256x256xf32>
    %cst_8 = arith.constant dense<0.000000e+00> : vector<8x256xf32>
    %9 = tpu.matmul %7, %8, %cst_8 {dimension_numbers = #tpu.dot_dimension_numbers<[1], [0], [0], [1], [0, 0, 1, 1], [], []>} : vector<8x256xf32>, vector<256x256xf32>, vector<8x256xf32> -> vector<8x256xf32>
    %c0_9 = arith.constant 0 : index
    %c0_10 = arith.constant 0 : index
    %10 = vector.load %arg5[%c0_9, %c0_10] : memref<1x256xf32, #tpu.memory_space<vmem>>, vector<1x256xf32>
    %11 = vector.broadcast %10 : vector<1x256xf32> to vector<8x256xf32>
    %12 = arith.addf %9, %11 : vector<8x256xf32>
    %cst_11 = arith.constant 0.000000e+00 : f32
    %13 = vector.broadcast %cst_11 : f32 to vector<8x256xf32>
    %14 = arith.maximumf %12, %13 : vector<8x256xf32>
    %c0_12 = arith.constant 0 : index
    %c0_13 = arith.constant 0 : index
    %15 = vector.load %arg6[%c0_12, %c0_13] : memref<256x128xf32, #tpu.memory_space<vmem>>, vector<256x128xf32>
    %cst_14 = arith.constant dense<0.000000e+00> : vector<8x128xf32>
    %16 = tpu.matmul %14, %15, %cst_14 {dimension_numbers = #tpu.dot_dimension_numbers<[1], [0], [0], [1], [0, 0, 1, 1], [], []>} : vector<8x256xf32>, vector<256x128xf32>, vector<8x128xf32> -> vector<8x128xf32>
    %c0_15 = arith.constant 0 : index
    %c0_16 = arith.constant 0 : index
    %17 = vector.load %arg7[%c0_15, %c0_16] : memref<1x128xf32, #tpu.memory_space<vmem>>, vector<1x128xf32>
    %18 = vector.broadcast %17 : vector<1x128xf32> to vector<8x128xf32>
    %19 = arith.addf %16, %18 : vector<8x128xf32>
    %c0_17 = arith.constant 0 : index
    %c0_18 = arith.constant 0 : index
    %20 = vector.load %arg8[%c0_17, %c0_18] : memref<8x128xf32, #tpu.memory_space<vmem>>, vector<8x128xf32>
    tpu.vector_store %arg8[%c0_17, %c0_18], %19 {strides = array<i32>} : memref<8x128xf32, #tpu.memory_space<vmem>>, vector<8x128xf32>,
    return
  }
  func.func @transform_0(%arg0: i32) -> (i32, i32) {
    %c0_i32 = arith.constant 0 : i32
    %c0_i32_0 = arith.constant 0 : i32
    return %arg0, %c0_i32 : i32, i32
  }
  func.func @transform_1(%arg0: i32) -> (i32, i32) {
    %c0_i32 = arith.constant 0 : i32
    %c0_i32_0 = arith.constant 0 : i32
    %c0_i32_1 = arith.constant 0 : i32
    return %c0_i32, %c0_i32_0 : i32, i32
  }
  func.func @transform_2(%arg0: i32) -> (i32, i32) {
    %c0_i32 = arith.constant 0 : i32
    %c0_i32_0 = arith.constant 0 : i32
    %c0_i32_1 = arith.constant 0 : i32
    return %c0_i32, %c0_i32_0 : i32, i32
  }
  func.func @transform_3(%arg0: i32) -> (i32, i32) {
    %c0_i32 = arith.constant 0 : i32
    %c0_i32_0 = arith.constant 0 : i32
    %c0_i32_1 = arith.constant 0 : i32
    return %c0_i32, %c0_i32_0 : i32, i32
  }
  func.func @transform_4(%arg0: i32) -> (i32, i32) {
    %c0_i32 = arith.constant 0 : i32
    %c0_i32_0 = arith.constant 0 : i32
    %c0_i32_1 = arith.constant 0 : i32
    return %c0_i32, %c0_i32_0 : i32, i32
  }
  func.func @transform_5(%arg0: i32) -> (i32, i32) {
    %c0_i32 = arith.constant 0 : i32
    %c0_i32_0 = arith.constant 0 : i32
    %c0_i32_1 = arith.constant 0 : i32
    return %c0_i32, %c0_i32_0 : i32, i32
  }
  func.func @transform_6(%arg0: i32) -> (i32, i32) {
    %c0_i32 = arith.constant 0 : i32
    %c0_i32_0 = arith.constant 0 : i32
    %c0_i32_1 = arith.constant 0 : i32
    return %c0_i32, %c0_i32_0 : i32, i32
  }
  func.func @transform_7(%arg0: i32) -> (i32, i32) {
    %c0_i32 = arith.constant 0 : i32
    %c0_i32_0 = arith.constant 0 : i32
    return %arg0, %c0_i32 : i32, i32
  }
}

</mosaic_0001>

<bundles_post_ra>
// kernel: tpu_custom_call.1
= control target key start
LH: loop header
LB: loop body
LE: loop exit
PB: predicated region body
PF: predicated region fallthrough
CT: control target
= control target key end

     0   :  { %12 = vsyncpa [#allocation3], 0  ;;  %s641_s0 = inlined_call_operand.hbm [shape: f32[8,8], index: 0, kind: input, shape index: {}]   ;;  %s642_s1 = inlined_call_operand.hbm [shape: f32[8,256], index: 1, kind: input, shape index: {}]   ;;  %s643_s2 = inlined_call_operand.hbm [shape: f32[1,256], index: 2, kind: input, shape index: {}]   ;;  %s644_s3 = inlined_call_operand.hbm [shape: f32[256,256], index: 3, kind: input, shape index: {}]   ;;  %s645_s4 = inlined_call_operand.vmem [shape: f32[1,256], index: 4, kind: input, shape index: {}]   ;;  %s646_s5 = inlined_call_operand.hbm [shape: f32[256,128], index: 5, kind: input, shape index: {}]   ;;  %s647_s6 = inlined_call_operand.vmem [shape: f32[1,128], index: 6, kind: input, shape index: {}]   ;;  %s648_s7 = inlined_call_operand.hbm [shape: f32[8,128], index: 7, kind: output, shape index: {}]  }
   0x1   :  { %13 = vsyncpa [#allocation6], 0 }
   0x2   :  { %14 = vsyncpa [#allocation9], 0  ;;  %s32_s26 = sshll.u32 %s642_s1, 4  ;;  %s33_s26 = int_to_ptr.hbm [resolvable:$true] %s32_s26 }
   0x3   :  { %15 = vsyncpa [#allocation4], 0  ;;  %s567_s27 = smov [#allocation5]   ;;  %s53_s8 = sshll.u32 %s644_s3, 4  ;;  %s54_s8 = int_to_ptr.hbm [resolvable:$true] %s53_s8 }
   0x4   :  { %s34_s28 = sshll.u32 %s567_s27, 4  ;;  %s568_s9 = smov [#allocation8]   ;;  %s35_s28 = int_to_ptr.vmem [resolvable:$true] %s34_s28 }
   0x5   :  { %37 = dma.hbm_to_vmem [thread:$0]  %s33_s26, 256, %s35_s28, [#allocation6]  }
   0x6   :  { %s55_s10 = sshll.u32 %s568_s9, 4  ;;  %s569_s11 = smov 256   ;;  %s56_s10 = int_to_ptr.vmem [resolvable:$true] %s55_s10 }
   0x7   :  { %s570_s12 = smov 16   ;;  %s21_s1 = sshll.u32 %s641_s0, 4  ;;  %s22_s1 = int_to_ptr.hbm [resolvable:$true] %s21_s1 }
   0x8   :  { %61 = dma.hbm_to_vmem [thread:$0]  %s54_s8, 8192, %s56_s10, [#allocation9], %s569_s11, %s569_s11, %s570_s12  }
   0x9   :  { %s571_s15 = smov [#allocation2]   ;;  %s43_s3 = sshll.u32 %s643_s2, 4  ;;  %s44_s3 = int_to_ptr.hbm [resolvable:$true] %s43_s3 }
   0xa   :  { %s23_s16 = sshll.u32 %s571_s15, 4  ;;  %s572_s19 = smov [#allocation7]   ;;  %s24_s16 = int_to_ptr.vmem [resolvable:$true] %s23_s16 }
   0xb   :  { %26 = dma.hbm_to_vmem [thread:$0]  %s22_s1, 128, %s24_s16, [#allocation3]  }
   0xc   :  { %s45_s20 = sshll.u32 %s572_s19, 4  ;;  %s68_s23 = sshll.u32 %s646_s5, 4  ;;  %s46_s20 = int_to_ptr.vmem [resolvable:$true] %s45_s20  ;;  %s69_s23 = int_to_ptr.hbm [resolvable:$true] %s68_s23 }
   0xd   :  { %48 = dma.hbm_to_vmem [thread:$0]  %s44_s3, 32, %s46_s20, [#allocation6]  }
   0xe   :  { %s573_s0 = smov [#allocation10]   ;;  %s574_s25 = smov 128  }
   0xf   :  { %s70_s24 = sshll.u32 %s573_s0, 4  ;;  %s575_s26 = smov 8   ;;  %s71_s24 = int_to_ptr.vmem [resolvable:$true] %s70_s24 }
  0x10   :  { %76 = dma.hbm_to_vmem [thread:$0]  %s69_s23, 4096, %s71_s24, [#allocation9], %s574_s25, %s574_s25, %s575_s26  }
  0x11   :  { %559 = dma.done.wait [#allocation3], 128  }
  0x12   :  { %560 = vsyncadd [#allocation3], 4294967168 }
  0x13   :  { %561 = dma.done.wait [#allocation6], 288  }
  0x14   :  { %562 = vsyncadd [#allocation6], 4294967008 }
  0x15   :  { %563 = dma.done.wait [#allocation9], 12288  }
  0x16   :  { %564 = vsyncadd [#allocation9], 4294955008  ;;  %vm108_vm0 = vcmask 64512   ;;  %v100_v0 = vld [vmem:[#allocation5] sm:$0xff]  ;;  %v99_v1 = vld [vmem:[#allocation2] sm:$0xff]  ;;  %s390_s9 = sshll.u32 %s648_s7, 4  ;;  %s391_s9 = int_to_ptr.hbm [resolvable:$true] %s390_s9 }
  0x17   :  { %v101_v2 = vld [vmem:[#allocation5 + $0x8] sm:$0xff]  ;;  %127 = vmatpush.msra.mxu0 %v100_v0  ;;  %v182_v5 = vld [vmem:[#allocation8 + $0xe0] sm:$0xff]  ;;  %v183_v7 = vld [vmem:[#allocation8 + $0xe8] sm:$0xff] }
  0x18   :  { %147 = vmatpush.msra.mxu1 %v101_v2  ;;  %v184_v3 = vld [vmem:[#allocation8 + $0xf0] sm:$0xff]  ;;  %v185_v4 = vld [vmem:[#allocation8 + $0xf8] sm:$0xff]  ;;  %402 = vmatmul.msk.f32.vlgmr.msra.gmra.mxu0 %vm108_vm0, %v99_v1  ;;  %v214_v9 = vld [vmem:[#allocation8 + $0x1e0] sm:$0xff] }
  0x19   :  { %403 = vmatmul.msk.f32.vlgmr.msra.gmra.mxu1 %vm108_vm0, %v99_v1  ;;  %v216_v6 = vld [vmem:[#allocation8 + $0x1f0] sm:$0xff]  ;;  %v217_v8 = vld [vmem:[#allocation8 + $0x1f8] sm:$0xff]  ;;  %224 = vmatpush.msra.mxu2 %v184_v3  ;;  %v215_v12 = vld [vmem:[#allocation8 + $0x1e8] sm:$0xff] }
  0x1a   :  { %264 = vmatpush.msrb.mxu0 %v185_v4  ;;  %244 = vmatpush.msra.mxu3 %v216_v6  ;;  %v180_v10 = vld [vmem:[#allocation8 + $0xd0] sm:$0xff]  ;;  %v181_v11 = vld [vmem:[#allocation8 + $0xd8] sm:$0xff]  ;;  %v178_v15 = vld [vmem:[#allocation8 + $0xc0] sm:$0xff] }
  0x1b   :  { %284 = vmatpush.msrb.mxu1 %v217_v8  ;;  %225 = vmatpush.msra.mxu2 %v182_v5  ;;  %v212_v13 = vld [vmem:[#allocation8 + $0x1d0] sm:$0xff]  ;;  %v213_v14 = vld [vmem:[#allocation8 + $0x1d8] sm:$0xff]  ;;  %v179_v16 = vld [vmem:[#allocation8 + $0xc8] sm:$0xff] }
  0x1c   :  { %265 = vmatpush.msrb.mxu0 %v183_v7  ;;  %245 = vmatpush.msra.mxu3 %v214_v9  ;;  %v210_v17 = vld [vmem:[#allocation8 + $0x1c0] sm:$0xff]  ;;  %v211_v18 = vld [vmem:[#allocation8 + $0x1c8] sm:$0xff]  ;;  %v176_v19 = vld [vmem:[#allocation8 + $0xb0] sm:$0xff] }
  0x1d   :  { %285 = vmatpush.msrb.mxu1 %v215_v12  ;;  %226 = vmatpush.msra.mxu2 %v180_v10  ;;  %v177_v20 = vld [vmem:[#allocation8 + $0xb8] sm:$0xff]  ;;  %v208_v21 = vld [vmem:[#allocation8 + $0x1b0] sm:$0xff]  ;;  %v174_v23 = vld [vmem:[#allocation8 + $0xa0] sm:$0xff] }
  0x1e   :  { %266 = vmatpush.msrb.mxu0 %v181_v11  ;;  %246 = vmatpush.msra.mxu3 %v212_v13  ;;  %v209_v22 = vld [vmem:[#allocation8 + $0x1b8] sm:$0xff]  ;;  %v175_v24 = vld [vmem:[#allocation8 + $0xa8] sm:$0xff]  ;;  %v206_v25 = vld [vmem:[#allocation8 + $0x1a0] sm:$0xff] }
  0x1f   :  { %286 = vmatpush.msrb.mxu1 %v213_v14  ;;  %227 = vmatpush.msra.mxu2 %v178_v15  ;;  %v207_v26 = vld [vmem:[#allocation8 + $0x1a8] sm:$0xff]  ;;  %v172_v27 = vld [vmem:[#allocation8 + $0x90] sm:$0xff]  ;;  %v173_v28 = vld [vmem:[#allocation8 + $0x98] sm:$0xff] }
  0x20   :  { %267 = vmatpush.msrb.mxu0 %v179_v16  ;;  %247 = vmatpush.msra.mxu3 %v210_v17  ;;  %v204_v29 = vld [vmem:[#allocation8 + $0x190] sm:$0xff]  ;;  %v205_v30 = vld [vmem:[#allocation8 + $0x198] sm:$0xff]  ;;  %v170_v31 = vld [vmem:[#allocation8 + $0x80] sm:$0xff] }
  0x21   :  { %287 = vmatpush.msrb.mxu1 %v211_v18  ;;  %228 = vmatpush.msra.mxu2 %v176_v19  ;;  %v171_v32 = vld [vmem:[#allocation8 + $0x88] sm:$0xff]  ;;  %v202_v33 = vld [vmem:[#allocation8 + $0x180] sm:$0xff]  ;;  %v168_v35 = vld [vmem:[#allocation8 + $0x70] sm:$0xff] }
  0x22   :  { %268 = vmatpush.msrb.mxu0 %v177_v20  ;;  %248 = vmatpush.msra.mxu3 %v208_v21  ;;  %v203_v34 = vld [vmem:[#allocation8 + $0x188] sm:$0xff]  ;;  %v169_v36 = vld [vmem:[#allocation8 + $0x78] sm:$0xff]  ;;  %v200_v37 = vld [vmem:[#allocation8 + $0x170] sm:$0xff] }
  0x23   :  { %288 = vmatpush.msrb.mxu1 %v209_v22  ;;  %229 = vmatpush.msra.mxu2 %v174_v23  ;;  %v201_v38 = vld [vmem:[#allocation8 + $0x178] sm:$0xff]  ;;  %v166_v39 = vld [vmem:[#allocation8 + $0x60] sm:$0xff]  ;;  %v167_v40 = vld [vmem:[#allocation8 + $0x68] sm:$0xff] }
  0x24   :  { %269 = vmatpush.msrb.mxu0 %v175_v24  ;;  %249 = vmatpush.msra.mxu3 %v206_v25  ;;  %v198_v41 = vld [vmem:[#allocation8 + $0x160] sm:$0xff]  ;;  %v199_v42 = vld [vmem:[#allocation8 + $0x168] sm:$0xff]  ;;  %v164_v43 = vld [vmem:[#allocation8 + $0x50] sm:$0xff] }
  0x25   :  { %289 = vmatpush.msrb.mxu1 %v207_v26  ;;  %230 = vmatpush.msra.mxu2 %v172_v27  ;;  %v165_v44 = vld [vmem:[#allocation8 + $0x58] sm:$0xff]  ;;  %v196_v45 = vld [vmem:[#allocation8 + $0x150] sm:$0xff]  ;;  %v162_v47 = vld [vmem:[#allocation8 + $0x40] sm:$0xff] }
  0x26   :  { %270 = vmatpush.msrb.mxu0 %v173_v28  ;;  %250 = vmatpush.msra.mxu3 %v204_v29  ;;  %v197_v46 = vld [vmem:[#allocation8 + $0x158] sm:$0xff]  ;;  %v163_v48 = vld [vmem:[#allocation8 + $0x48] sm:$0xff]  ;;  %v194_v49 = vld [vmem:[#allocation8 + $0x140] sm:$0xff] }
  0x27   :  { %290 = vmatpush.msrb.mxu1 %v205_v30  ;;  %231 = vmatpush.msra.mxu2 %v170_v31  ;;  %v195_v50 = vld [vmem:[#allocation8 + $0x148] sm:$0xff]  ;;  %v160_v51 = vld [vmem:[#allocation8 + $0x30] sm:$0xff]  ;;  %v161_v52 = vld [vmem:[#allocation8 + $0x38] sm:$0xff] }
  0x28   :  { %271 = vmatpush.msrb.mxu0 %v171_v32  ;;  %251 = vmatpush.msra.mxu3 %v202_v33  ;;  %v158_v53 = vld [vmem:[#allocation8 + $0x20] sm:$0xff]  ;;  %v192_v54 = vld [vmem:[#allocation8 + $0x130] sm:$0xff]  ;;  %v159_v55 = vld [vmem:[#allocation8 + $0x28] sm:$0xff] }
  0x29   :  { %291 = vmatpush.msrb.mxu1 %v203_v34  ;;  %232 = vmatpush.msra.mxu2 %v168_v35  ;;  %v193_v56 = vld [vmem:[#allocation8 + $0x138] sm:$0xff]  ;;  %v156_v57 = vld [vmem:[#allocation8 + $0x10] sm:$0xff]  ;;  %v190_v58 = vld [vmem:[#allocation8 + $0x120] sm:$0xff] }
  0x2a   :  { %272 = vmatpush.msrb.mxu0 %v169_v36  ;;  %252 = vmatpush.msra.mxu3 %v200_v37  ;;  %v157_v59 = vld [vmem:[#allocation8 + $0x18] sm:$0xff]  ;;  %v191_v60 = vld [vmem:[#allocation8 + $0x128] sm:$0xff]  ;;  %v154_v61 = vld [vmem:[#allocation8] sm:$0xff] }
  0x2b   :  { %292 = vmatpush.msrb.mxu1 %v201_v38  ;;  %233 = vmatpush.msra.mxu2 %v166_v39  ;;  %v188_v62 = vld [vmem:[#allocation8 + $0x110] sm:$0xff]  ;;  %v155_v63 = vld [vmem:[#allocation8 + $0x8] sm:$0xff]  ;;  %v189_v0 = vld [vmem:[#allocation8 + $0x118] sm:$0xff] }
  0x2c   :  { %273 = vmatpush.msrb.mxu0 %v167_v40  ;;  %253 = vmatpush.msra.mxu3 %v198_v41  ;;  %v186_v1 = vld [vmem:[#allocation8 + $0x100] sm:$0xff]  ;;  %v187_v2 = vld [vmem:[#allocation8 + $0x108] sm:$0xff]  ;;  %v337_v3 = vld [vmem:[#allocation10 + $0xf8] sm:$0xff] }
  0x2d   :  { %293 = vmatpush.msrb.mxu1 %v199_v42  ;;  %234 = vmatpush.msra.mxu2 %v164_v43  ;;  %v336_v4 = vld [vmem:[#allocation10 + $0xf0] sm:$0xff]  ;;  %v321_v5 = vld [vmem:[#allocation10 + $0x78] sm:$0xff]  ;;  %v335_v7 = vld [vmem:[#allocation10 + $0xe8] sm:$0xff] }
  0x2e   :  { %274 = vmatpush.msrb.mxu0 %v165_v44  ;;  %254 = vmatpush.msra.mxu3 %v196_v45  ;;  %v320_v6 = vld [vmem:[#allocation10 + $0x70] sm:$0xff]  ;;  %v319_v8 = vld [vmem:[#allocation10 + $0x68] sm:$0xff]  ;;  %v334_v9 = vld [vmem:[#allocation10 + $0xe0] sm:$0xff] }
  0x2f   :  { %294 = vmatpush.msrb.mxu1 %v197_v46  ;;  %235 = vmatpush.msra.mxu2 %v162_v47  ;;  %v318_v10 = vld [vmem:[#allocation10 + $0x60] sm:$0xff]  ;;  %v333_v11 = vld [vmem:[#allocation10 + $0xd8] sm:$0xff]  ;;  %v332_v13 = vld [vmem:[#allocation10 + $0xd0] sm:$0xff] }
  0x30   :  { %275 = vmatpush.msrb.mxu0 %v163_v48  ;;  %255 = vmatpush.msra.mxu3 %v194_v49  ;;  %v317_v12 = vld [vmem:[#allocation10 + $0x58] sm:$0xff]  ;;  %v316_v14 = vld [vmem:[#allocation10 + $0x50] sm:$0xff]  ;;  %v331_v15 = vld [vmem:[#allocation10 + $0xc8] sm:$0xff] }
  0x31   :  { %295 = vmatpush.msrb.mxu1 %v195_v50  ;;  %236 = vmatpush.msra.mxu2 %v160_v51  ;;  %v315_v16 = vld [vmem:[#allocation10 + $0x48] sm:$0xff]  ;;  %v330_v17 = vld [vmem:[#allocation10 + $0xc0] sm:$0xff]  ;;  %v329_v19 = vld [vmem:[#allocation10 + $0xb8] sm:$0xff] }
  0x32   :  { %276 = vmatpush.msrb.mxu0 %v161_v52  ;;  %256 = vmatpush.msra.mxu3 %v192_v54  ;;  %v314_v18 = vld [vmem:[#allocation10 + $0x40] sm:$0xff]  ;;  %v313_v20 = vld [vmem:[#allocation10 + $0x38] sm:$0xff]  ;;  %v328_v21 = vld [vmem:[#allocation10 + $0xb0] sm:$0xff] }
  0x33   :  { %237 = vmatpush.msra.mxu2 %v158_v53  ;;  %296 = vmatpush.msrb.mxu1 %v193_v56  ;;  %v327_v22 = vld [vmem:[#allocation10 + $0xa8] sm:$0xff]  ;;  %v102_v23 = vld [vmem:[#allocation7] sm:$0x3]  ;;  %v326_v24 = vld [vmem:[#allocation10 + $0xa0] sm:$0xff] }
  0x34   :  { %277 = vmatpush.msrb.mxu0 %v159_v55  ;;  %257 = vmatpush.msra.mxu3 %v190_v58  ;;  %v104_v25 = vperm.slane %v102_v23, 0  ;;  %v105_v26 = vperm.slane %v102_v23, 1  ;;  %v312_v33 = vld [vmem:[#allocation10 + $0x30] sm:$0xff]  ;;  %v325_v34 = vld [vmem:[#allocation10 + $0x98] sm:$0xff]  ;;  %v311_v35 = vld [vmem:[#allocation10 + $0x28] sm:$0xff] }
  0x35   :  { %238 = vmatpush.msra.mxu2 %v156_v57  ;;  %297 = vmatpush.msrb.mxu1 %v191_v60  ;;  %v324_v36 = vld [vmem:[#allocation10 + $0x90] sm:$0xff]  ;;  %v310_v37 = vld [vmem:[#allocation10 + $0x20] sm:$0xff]  ;;  %v323_v38 = vld [vmem:[#allocation10 + $0x88] sm:$0xff] }
  0x36   :  { %278 = vmatpush.msrb.mxu0 %v157_v59  ;;  %258 = vmatpush.msra.mxu3 %v188_v62  ;;  %v309_v39 = vld [vmem:[#allocation10 + $0x18] sm:$0xff]  ;;  %v322_v40 = vld [vmem:[#allocation10 + $0x80] sm:$0xff]  ;;  %v308_v41 = vld [vmem:[#allocation10 + $0x10] sm:$0xff] }
  0x37   :  { %239 = vmatpush.msra.mxu2 %v154_v61  ;;  %298 = vmatpush.msrb.mxu1 %v189_v0  ;;  %v307_v42 = vld [vmem:[#allocation10 + $0x8] sm:$0xff]  ;;  %v306_v43 = vld [vmem:[#allocation10] sm:$0xff] }
  0x38   :  { %279 = vmatpush.msrb.mxu0 %v155_v63  ;;  %259 = vmatpush.msra.mxu3 %v186_v1  ;;  %v218_v44 = vld [vmem:[%s645_s4] sm:$0x3]  ;;  %s576_s4 = smov [#allocation11]  }
  0x39   :  { %299 = vmatpush.msrb.mxu1 %v187_v2  ;;  %342 = vmatpush.msrb.mxu2 %v321_v5  ;;  %v221_v45 = vperm.slane %v218_v44, 1  ;;  %v220_v50 = vperm.slane %v218_v44, 0  ;;  %v414_v57 = vld [vmem:[%s647_s6] ss:$0 sm:$0xff]  ;;  %s388_s29 = sshll.u32 %s576_s4, 4  ;;  %s389_s29 = int_to_ptr.vmem [resolvable:$true] %s388_s29 }
  0x3a   :  { %362 = vmatpush.msrb.mxu3 %v337_v3 }
  0x3b   :  { %343 = vmatpush.msrb.mxu2 %v320_v6 }
  0x3c   :  { %363 = vmatpush.msrb.mxu3 %v336_v4 }
  0x3d   :  { %344 = vmatpush.msrb.mxu2 %v319_v8 }
  0x3e   :  { %364 = vmatpush.msrb.mxu3 %v335_v7 }
  0x3f   :  { %345 = vmatpush.msrb.mxu2 %v318_v10 }
  0x40   :  { %365 = vmatpush.msrb.mxu3 %v334_v9 }
  0x41   :  { %346 = vmatpush.msrb.mxu2 %v317_v12 }
  0x42   :  { %366 = vmatpush.msrb.mxu3 %v333_v11 }
  0x43   :  { %347 = vmatpush.msrb.mxu2 %v316_v14 }
  0x44   :  { %367 = vmatpush.msrb.mxu3 %v332_v13 }
  0x45   :  { %348 = vmatpush.msrb.mxu2 %v315_v16 }
  0x46   :  { %368 = vmatpush.msrb.mxu3 %v331_v15 }
  0x47   :  { %349 = vmatpush.msrb.mxu2 %v314_v18 }
  0x48   :  { %369 = vmatpush.msrb.mxu3 %v330_v17 }
  0x49   :  { %350 = vmatpush.msrb.mxu2 %v313_v20 }
  0x4a   :  { %370 = vmatpush.msrb.mxu3 %v329_v19 }
  0x4b   :  { %351 = vmatpush.msrb.mxu2 %v312_v33 }
  0x4c   :  { %371 = vmatpush.msrb.mxu3 %v328_v21 }
  0x4d   :  { %352 = vmatpush.msrb.mxu2 %v311_v35 }
  0x4e   :  { %372 = vmatpush.msrb.mxu3 %v327_v22 }
  0x4f   :  { %353 = vmatpush.msrb.mxu2 %v310_v37 }
  0x50   :  { %373 = vmatpush.msrb.mxu3 %v326_v24 }
  0x51   :  { %354 = vmatpush.msrb.mxu2 %v309_v39 }
  0x52   :  { %374 = vmatpush.msrb.mxu3 %v325_v34 }
  0x53   :  { %355 = vmatpush.msrb.mxu2 %v308_v41 }
  0x54   :  { %375 = vmatpush.msrb.mxu3 %v324_v36 }
  0x55   :  { %356 = vmatpush.msrb.mxu2 %v307_v42 }
  0x56   :  { %376 = vmatpush.msrb.mxu3 %v323_v38 }
  0x57   :  { %357 = vmatpush.msrb.mxu2 %v306_v43 }
  0x58   :  { %377 = vmatpush.msrb.mxu3 %v322_v40 }
  0x95   :  { %v129_v27 = vpop.f32.mrf.mxu0 }
  0x96   :  { %v149_v28 = vpop.f32.mrf.mxu1  ;;  %v130_v29 = vadd.f32 %v129_v27, %v104_v25 }
  0x97   :  { %v150_v30 = vadd.f32 %v149_v28, %v105_v26 }
  0x98   :  { %v152_v31 = vmax.f32 %v130_v29, 0.0 }
  0x99   :  { %v153_v32 = vmax.f32 %v150_v30, 0.0 }
  0x9a   :  { %240 = vmatmul.f32.vlgmr.msra.gmra.mxu2 %v152_v31  ;;  %280 = vmatmul.f32.vlgmr.msrb.gmra.mxu0 %v152_v31 }
  0x9b   :  { %260 = vmatmul.f32.vlgmr.msra.gmra.mxu3 %v153_v32  ;;  %300 = vmatmul.f32.vlgmr.msrb.gmra.mxu1 %v153_v32 }
 0x117   :  { %v281_v46 = vpop.f32.mrf.mxu0 }
 0x118   :  { %v282_v47 = vadd.f32 %v281_v46, %v221_v45  ;;  %v301_v48 = vpop.f32.mrf.mxu1 }
 0x11a   :  { %v302_v49 = vadd.f32 %v301_v48, %v282_v47 }
 0x11c   :  { %v305_v51 = vmax.f32 %v302_v49, 0.0 }
 0x11d   :  { %v241_v52 = vpop.f32.mrf.mxu2 }
 0x11e   :  { %v242_v53 = vadd.f32 %v241_v52, %v220_v50  ;;  %378 = vmatmul.f32.vlgmr.msrb.gmra.mxu3 %v305_v51  ;;  %v261_v54 = vpop.f32.mrf.mxu3 }
 0x120   :  { %v262_v55 = vadd.f32 %v261_v54, %v242_v53 }
 0x122   :  { %v304_v56 = vmax.f32 %v262_v55, 0.0 }
 0x124   :  { %358 = vmatmul.f32.vlgmr.msrb.gmra.mxu2 %v304_v56 }
 0x1a1   :  { %v379_v60 = vpop.f32.mrf.mxu3 }
 0x1a7   :  { %v359_v58 = vpop.f32.mrf.mxu2 }
 0x1a8   :  { %v360_v59 = vadd.f32 %v414_v57, %v359_v58 }
 0x1aa   :  { %v380_v61 = vadd.f32 %v379_v60, %v360_v59 }
 0x1ac   :  { %382 = vst [vmem:[#allocation11] sm:$0xff] %v380_v61 }
 0x1ad   :  { %393 = dma.vmem_to_hbm [thread:$0]  %s389_s29, 128, %s391_s9, [#allocation4]  }
 0x1ae   :  { %565 = dma.done.wait [#allocation4], 128  }
 0x1af   :  { %566 = vsyncadd [#allocation4], 4294967168 }
 0x1b0   :  { %398 = vsyncpa [#allocation3], 1 }
 0x1b1   :  { %399 = vsyncpa [#allocation6], 1 }
 0x1b2   :  { %400 = vsyncpa [#allocation9], 1 }
 0x1b3   :  { %401 = vsyncpa [#allocation4], 1 }

</bundles_post_ra>
